<compile_context>
chip_gen: v7x
topology: tpu7x:2x2x1
jax: 0.10.0
libtpu: 0.0.40
codegen_flags: <defaults>
</compile_context>

<pallas_src>
import numpy as np
import jax
import jax.numpy as jnp
from jax import lax
from jax.experimental import pallas as pl
from jax.experimental.pallas import tpu as pltpu

IMAGE_SIZE = 128  # original module uses 224; same math, smaller test size


def create_dct_matrix(N: int) -> np.ndarray:
    """Orthonormal DCT-II matrix, identical to the PyTorch module's buffer."""
    dct = np.zeros((N, N), dtype=np.float64)
    for k in range(N):
        for n in range(N):
            if k == 0:
                dct[k, n] = np.sqrt(1.0 / N)
            else:
                dct[k, n] = np.sqrt(2.0 / N) * np.cos(np.pi * k * (2 * n + 1) / (2 * N))
    return dct.astype(np.float32)


def _pick_block_images(bc: int, target: int = 16, min_grid: int = 4) -> int:
    """Images per grid step.

    Large enough to amortize the ~0.35 us per-step pipeline overhead and keep
    per-step DMAs fat (target=16 -> ~3 MiB/block at N=224, ~1 MiB at N=128),
    small enough that double-buffered in/out blocks plus kernel temporaries
    stay well inside v7x's 64 MiB VMEM (cap 16 at N=224; v5e/v6e can pass
    block_images=32), and small enough that the grid keeps >= min_grid steps
    so the single 'parallel' grid axis shards evenly across v7x's two
    TensorCores with DMA/compute overlap inside each core.
    """
    if bc <= 0:
        return 1
    tb = max(1, min(target, -(-bc // min_grid)))  # ceil(bc / min_grid), capped
    return tb


def _make_dct_kernel(compute_dtype):
    def _dct_kernel(d_ref, x_ref, o_ref):
        tb, n, _ = x_ref.shape
        d = d_ref[...].astype(compute_dtype)                 # (N, N), resident weight
        contract_lanes = (((1,), (1,)), ((), ()))            # contract lane dims -> "@ D^T"

        # ---- Row DCT:  R[b] = X[b] @ D^T  (one flattened large-M matmul) ----
        # Layout-preserving reshape: merges leading dims only (N % 8 == 0).
        x2d = x_ref[...].astype(compute_dtype).reshape(tb * n, n)
        r2d = lax.dot_general(x2d, d, contract_lanes,
                              preferred_element_type=jnp.float32)

        # ---- XLU transpose per image so the column DCT is also one flattened
        #      matmul against the SAME resident D (no broadcast, no per-image
        #      MXU weight reloads/drains). ----------------------------------
        r_t = jnp.swapaxes(r2d.reshape(tb, n, n), 1, 2).astype(compute_dtype)

        # ---- Column DCT:  S[b] = R[b]^T @ D^T = (D @ R[b])^T = Y[b]^T -------
        s2d = lax.dot_general(r_t.reshape(tb * n, n), d, contract_lanes,
                              preferred_element_type=jnp.float32)

        # ---- Transpose back and store. --------------------------------------
        y = jnp.swapaxes(s2d.reshape(tb, n, n), 1, 2)
        o_ref[...] = y.astype(o_ref.dtype)

    return _dct_kernel


def dct_layer(x: jax.Array, dct_matrix: jax.Array, block_images=None,
              compute_dtype=jnp.float32, out_dtype=None) -> jax.Array:
    """Pallas implementation of DCTLayer.forward. x: (B, C, H, W)."""
    batch, channels, height, width = x.shape
    n = dct_matrix.shape[0]
    assert height == n and width == n, "Input dimensions must match the DCT size"
    assert n % 8 == 0, "DCT size must be a multiple of 8 (sublane-aligned reshapes)"
    out_dtype = x.dtype if out_dtype is None else out_dtype

    bc = batch * channels
    x_flat = x.reshape(bc, n, n)

    tb = _pick_block_images(bc) if block_images is None else block_images
    grid_len = pl.cdiv(bc, tb)
    bc_pad = grid_len * tb
    if bc_pad != bc:
        # Cheap zero pad instead of collapsing to 1 image/step for awkward bc.
        x_flat = jnp.pad(x_flat, ((0, bc_pad - bc), (0, 0), (0, 0)))

    # Advisory cost hint for XLA scheduling: two N^3 matmuls per image.
    in_bytes = jnp.dtype(x.dtype).itemsize
    out_bytes = jnp.dtype(out_dtype).itemsize
    cost = pl.CostEstimate(
        flops=4 * bc_pad * n * n * n,
        transcendentals=0,
        bytes_accessed=bc_pad * n * n * (in_bytes + out_bytes) + n * n * 4,
    )

    out_flat = pl.pallas_call(
        _make_dct_kernel(compute_dtype),
        out_shape=jax.ShapeDtypeStruct((bc_pad, n, n), out_dtype),
        grid_spec=pltpu.PrefetchScalarGridSpec(
            num_scalar_prefetch=0,
            grid=(grid_len,),
            in_specs=[
                pl.BlockSpec((n, n), lambda i: (0, 0)),          # D (resident, shared)
                pl.BlockSpec((tb, n, n), lambda i: (i, 0, 0)),   # TB images per step
            ],
            out_specs=pl.BlockSpec((tb, n, n), lambda i: (i, 0, 0)),
        ),
        compiler_params=pltpu.CompilerParams(
            dimension_semantics=("parallel",),
            # TB=16 at N=224: ~12 MiB double-buffered I/O + ~15 MiB temporaries
            # -> ~28 MiB, inside this 48 MiB scoped limit and v7x's 64 MiB
            # physical VMEM; also raises the small v5e/v6e scoped defaults.
            vmem_limit_bytes=48 * 1024 * 1024,
        ),
        cost_estimate=cost,
    )(dct_matrix, x_flat)

    if bc_pad != bc:
        out_flat = out_flat[:bc]
    return out_flat.reshape(batch, channels, height, width)


if __name__ == "__main__":
    key = jax.random.PRNGKey(0)
    B, C = 2, 4
    x = jax.random.normal(key, (B, C, IMAGE_SIZE, IMAGE_SIZE), dtype=jnp.float32)

    dct_matrix = jnp.asarray(create_dct_matrix(IMAGE_SIZE))

    out = jax.block_until_ready(dct_layer(x, dct_matrix))

    # Pure-JAX reference: D @ (X @ D^T) per image.
    x_flat = x.reshape(B * C, IMAGE_SIZE, IMAGE_SIZE)
    ref = jnp.einsum("kh,bhw,lw->bkl", dct_matrix, x_flat, dct_matrix)
    ref = ref.reshape(B, C, IMAGE_SIZE, IMAGE_SIZE)

    np.testing.assert_allclose(np.asarray(out), np.asarray(ref), rtol=1e-4, atol=1e-4)
    print("KERNEL_OK")
</pallas_src>

<mosaic_0001>
module attributes {stable_mosaic.version = 11 : i64} {
  func.func @_dct_kernel(%arg0: i32, %arg1: memref<128x128xf32, #tpu.memory_space<vmem>>, %arg2: memref<2x128x128xf32, #tpu.memory_space<vmem>>, %arg3: memref<2x128x128xf32, #tpu.memory_space<vmem>>) attributes {dimension_semantics = [#tpu.dimension_semantics<parallel>], iteration_bounds = array<i64: 4>, scalar_prefetch = 0 : i64, scratch_operands = 0 : i64, tpu.core_type = #tpu.core_type<tc>, window_params = [{pipeline_mode = #tpu.pipeline_mode<synchronous>, transform_indices = @transform_0, window_bounds = array<i64: 128, 128>}, {transform_indices = @transform_1, window_bounds = array<i64: 2, 128, 128>}, {transform_indices = @transform_2, window_bounds = array<i64: 2, 128, 128>}]} {
    %c0 = arith.constant 0 : index
    %c0_0 = arith.constant 0 : index
    %0 = vector.load %arg1[%c0, %c0_0] : memref<128x128xf32, #tpu.memory_space<vmem>>, vector<128x128xf32>
    %c0_1 = arith.constant 0 : index
    %c0_2 = arith.constant 0 : index
    %c0_3 = arith.constant 0 : index
    %1 = vector.load %arg2[%c0_1, %c0_2, %c0_3] : memref<2x128x128xf32, #tpu.memory_space<vmem>>, vector<2x128x128xf32>
    %2 = vector.shape_cast %1 : vector<2x128x128xf32> to vector<256x128xf32>
    %cst = arith.constant dense<0.000000e+00> : vector<256x128xf32>
    %3 = tpu.matmul %2, %0, %cst {dimension_numbers = #tpu.dot_dimension_numbers<[1], [1], [0], [0], [0, 0, 1, 0], [], []>} : vector<256x128xf32>, vector<128x128xf32>, vector<256x128xf32> -> vector<256x128xf32>
    %4 = vector.shape_cast %3 : vector<256x128xf32> to vector<2x128x128xf32>
    %5 = tpu.transpose %4, [0, 2, 1] : vector<2x128x128xf32> -> vector<2x128x128xf32>
    %6 = vector.shape_cast %5 : vector<2x128x128xf32> to vector<256x128xf32>
    %cst_4 = arith.constant dense<0.000000e+00> : vector<256x128xf32>
    %7 = tpu.matmul %6, %0, %cst_4 {dimension_numbers = #tpu.dot_dimension_numbers<[1], [1], [0], [0], [0, 0, 1, 0], [], []>} : vector<256x128xf32>, vector<128x128xf32>, vector<256x128xf32> -> vector<256x128xf32>
    %8 = vector.shape_cast %7 : vector<256x128xf32> to vector<2x128x128xf32>
    %9 = tpu.transpose %8, [0, 2, 1] : vector<2x128x128xf32> -> vector<2x128x128xf32>
    %c0_5 = arith.constant 0 : index
    %c0_6 = arith.constant 0 : index
    %c0_7 = arith.constant 0 : index
    %10 = vector.load %arg3[%c0_5, %c0_6, %c0_7] : memref<2x128x128xf32, #tpu.memory_space<vmem>>, vector<2x128x128xf32>
    tpu.vector_store %arg3[%c0_5, %c0_6, %c0_7], %9 {strides = array<i32>} : memref<2x128x128xf32, #tpu.memory_space<vmem>>, vector<2x128x128xf32>,
    return
  }
  func.func @transform_0(%arg0: i32) -> (i32, i32) {
    %c0_i32 = arith.constant 0 : i32
    %c0_i32_0 = arith.constant 0 : i32
    %c0_i32_1 = arith.constant 0 : i32
    return %c0_i32, %c0_i32_0 : i32, i32
  }
  func.func @transform_1(%arg0: i32) -> (i32, i32, i32) {
    %c0_i32 = arith.constant 0 : i32
    %c0_i32_0 = arith.constant 0 : i32
    %c0_i32_1 = arith.constant 0 : i32
    return %arg0, %c0_i32, %c0_i32_0 : i32, i32, i32
  }
  func.func @transform_2(%arg0: i32) -> (i32, i32, i32) {
    %c0_i32 = arith.constant 0 : i32
    %c0_i32_0 = arith.constant 0 : i32
    %c0_i32_1 = arith.constant 0 : i32
    return %arg0, %c0_i32, %c0_i32_0 : i32, i32, i32
  }
}

</mosaic_0001>

<bundles_post_ra>
// kernel: tpu_custom_call.1
= control target key start
LH: loop header
LB: loop body
LE: loop exit
PB: predicated region body
PF: predicated region fallthrough
CT: control target
= control target key end

     0   :  { %7 = vsyncpa [#allocation3], 0  ;;  %s1764_s0 = inlined_call_operand.hbm [shape: f32[128,128], index: 0, kind: input, shape index: {}]   ;;  %s1765_s1 = inlined_call_operand.hbm [shape: f32[8,128,128], index: 1, kind: input, shape index: {}]   ;;  %s1766_s2 = inlined_call_operand.hbm [shape: f32[8,128,128], index: 2, kind: output, shape index: {}]  }
   0x1   :  { %8 = vsyncpa [#allocation6], 0 }
   0x2   :  { %10 = vsyncpa [#allocation6 + $0x1], 0 }
   0x3   :  { %11 = vsyncpa [#allocation4], 0 }
   0x4   :  { %13 = vsyncpa [#allocation4 + $0x1], 0  ;;  %s1493_s9 = smov 0   ;;  %s1495_s10 = smov 0  }
   0x5   :  { %s1497_s11 = smov 0   ;;  %s1499_s12 = smov 0  }
   0x6 LB: > { %s1514_s13 = sadd.s32 4294967295, %s1469_s12   ;;  %s938_s14 = sadd.s32 4294967294, %s1469_s12   ;;  %s1469_s12 = sphi %s1499_s12, %s1785_s12   ;;  %s1465_s11 = sphi %s1497_s11, %s1784_s11   ;;  %s1461_s10 = sphi %s1495_s10, %s1783_s10   ;;  %s1457_s9 = sphi %s1493_s9, %s1782_s9  }
   0x7   : > { %p60_p0 = scmp.ne.s32.totalorder %s1461_s10, %s1457_s9  ;;  %p1767_p1 = scmp.eq.s32.totalorder %s1514_s13, 0 }
   0x8   : > { %p90_p3 = scmp.eq.s32.totalorder %s938_s14, 3  ;;  %p939_p5 = scmp.ge.s32.totalorder %s1469_s12, 1 }
   0x9   : > { %p1523_p4 = por %p1767_p1, %p60_p0  ;;  %p97_p7 = scmp.lt.s32.totalorder %s1469_s12, 5 }
   0xa   : > { %p1528_p6 = por %p90_p3, %p60_p0  ;;  %s1471_s18 = smov [#allocation2]  }
   0xb   : > { %s1770_s15 = scalar_select %p1523_p4, 1, 0 }
   0xc   : > { %s1771_s16 = scalar_select %p1528_p6, 1, 0 }
   0xd   : > { %p1533_p8 = pnand %p939_p5, %p97_p7  ;;  %s109_s19 = sshll.u32 %s1471_s18, 4  ;;  %s110_s19 = int_to_ptr.vmem [resolvable:$true] %s109_s19 }
   0xe   : > { %s1546_s21 = sadd.s32 1, %s1469_s12   ;;  %s47_s22 = sadd.s32 1, %s1465_s11 }
   0xf   : > { %s1772_s17 = scalar_select %p1533_p8, 1, 0 }
  0x10   : > { %p1288_p9 = pneg %p1533_p8  ;;  %s44_s23 = ssub.s32 %s1469_s12, %s1546_s21 }
  0x11   : > { %s1341_s26 = scalar_lea.hbm %s1764_s0, 2048 }
  0x12   : > { %p1541_p10 = pnand %p1288_p9, %p1767_p1  ;;  %p1342_p11 = scmp.ne.s32.totalorder %s1764_s0, %s1341_s26 }
  0x13   : > { %p1348_p3 = scmp.lt.u32.totalorder %s1341_s26, %s1764_s0 }
  0x14   : > { %p1343_p12 = pneg %p1541_p10 }
  0x16   : > { %p1344_p13 = pnand %p1343_p12, %p1342_p11 }
  0x18   : > { %p1345_p0 = pneg %p1344_p13 }
  0x1a   : > { %p1350_p5 = pnand %p1348_p3, %p1345_p0 }
  0x1c   : > { %1353 = shalt.err (!%p1350_p5)
}
  0x1d   : > { %s1354_s3 = scalar_lea.vmem %s110_s19, 2048  ;;  %p1362_p2 = scmp.lt.s32.totalorder %s110_s19, %s110_s19 }
  0x1e   : > { %p1355_p7 = scmp.ne.s32.totalorder %s110_s19, %s1354_s3  ;;  %p1363_p6 = scmp.lt.s32.totalorder %s1354_s3, %s1354_s3 }
  0x20   : > { %p1357_p9 = pnand %p1355_p7, %p1343_p12  ;;  %p1364_p4 = por %p1363_p6, %p1362_p2 }
  0x22   : > { %p1358_p1 = pneg %p1357_p9 }
  0x24   : > { %p1365_p8 = pnand %p1364_p4, %p1358_p1 }
  0x26   : > { %1368 = shalt.err (!%p1365_p8)
}
  0x27   : > { %s1472_s4 = smov 128   ;;  %s1473_s5 = smov 8  }
  0x28   : > { %1291 = dma.hbm_to_vmem [thread:$0]  (!%p1541_p10), %s1764_s0, 2048, %s110_s19, [#allocation3], %s1472_s4, %s1472_s4, %s1473_s5  }
  0x29   : > { %p45_p1 = scmp.eq.s32.totalorder %s44_s23, 0  ;;  %p54_p2 = scmp.ne.s32.totalorder %s1465_s11, %s1461_s10 }
  0x2a   : > { %p55_p4 = scmp.eq.s32.totalorder %s1469_s12, 0  ;;  %p1301_p6 = scmp.lt.s32.totalorder %s1469_s12, 4 }
  0x2b   : > { %s1575_s8 = scalar_select %p45_p1, %s1465_s11, %s47_s22  }
  0x2c   : > { %p56_p8 = por %p55_p4, %p54_p2  ;;  %p1774_p11 = scmp.eq.s32.totalorder %s1514_s13, 3 }
  0x2d   : > { %s123_s18 = sand.u32 1, %s1465_s11   ;;  %s957_s20 = sshll.u32 %s1469_s12, 12 }
  0x2e   : > { %p1579_p12 = por %p1774_p11, %p54_p2  ;;  %s942_s24 = sshll.u32 %s123_s18, 8 }
  0x2f   : > { %s1588_s27 = scalar_lea.hbm %s1765_s1, %s957_s20  ;;  %s127_s19 = scalar_lea.vmem [#allocation5], %s942_s24 }
  0x30   : > { %s135_s22 = sshll.u32 %s127_s19, 4  ;;  %p1590_p10 = pnand %p1301_p6, %p56_p8  ;;  %s1594_s22 = int_to_ptr.vmem [resolvable:$true] %s135_s22 }
  0x31   : > { %s1596_s28 = scalar_lea.sflag [#allocation6], %s123_s18  ;;  %s1369_s29 = scalar_lea.hbm %s1588_s27, 4096 }
  0x32   : > { %p1370_p13 = scmp.ne.s32.totalorder %s1588_s27, %s1369_s29  ;;  %p1371_p0 = pneg %p1590_p10 }
  0x33   : > { %s1374_s6 = scalar_lea.hbm %s1765_s1, 16384  ;;  %p1375_p7 = scmp.lt.u32.totalorder %s1588_s27, %s1765_s1 }
  0x34   : > { %p1372_p3 = pnand %p1371_p0, %p1370_p13  ;;  %p1376_p9 = scmp.lt.u32.totalorder %s1374_s6, %s1369_s29 }
  0x35   : > { %p1378_p2 = scmp.lt.u32.totalorder %s1369_s29, %s1588_s27 }
  0x36   : > { %p1373_p5 = pneg %p1372_p3  ;;  %p1377_p1 = por %p1376_p9, %p1375_p7 }
  0x38   : > { %p1379_p4 = por %p1378_p2, %p1377_p1 }
  0x3a   : > { %p1380_p6 = pnand %p1379_p4, %p1373_p5 }
  0x3c   : > { %1383 = shalt.err (!%p1380_p6)
}
  0x3d   : > { %s1384_s18 = scalar_lea.vmem %s1594_s22, 4096  ;;  %s1474_s24 = smov [#allocation5]  }
  0x3e   : > { %p1385_p8 = scmp.ne.s32.totalorder %s1594_s22, %s1384_s18  ;;  %s1389_s25 = sshll.u32 %s1474_s24, 4  ;;  %s1390_s25 = int_to_ptr.vmem [resolvable:$false] %s1389_s25 }
  0x3f   : > { %s1391_s26 = scalar_lea.vmem %s1390_s25, 8192  ;;  %p1392_p3 = scmp.lt.s32.totalorder %s1594_s22, %s1390_s25 }
  0x40   : > { %p1387_p11 = pnand %p1385_p8, %p1371_p0  ;;  %p1393_p7 = scmp.lt.s32.totalorder %s1391_s26, %s1384_s18 }
  0x42   : > { %p1388_p13 = pneg %p1387_p11  ;;  %p1394_p9 = por %p1393_p7, %p1392_p3 }
  0x44   : > { %p1395_p1 = pnand %p1394_p9, %p1388_p13 }
  0x46   : > { %1398 = shalt.err (!%p1395_p1)
}
  0x47   : > { %1295 = dma.hbm_to_vmem [thread:$0]  (!%p1590_p10), %s1588_s27, 4096, %s1594_s22, %s1596_s28, %s1472_s4, %s1472_s4, %s1473_s5  }
  0x48   : > { %p1777_p0 = scmp.ne.s32.totalorder %s1772_s17, 0 }
  0x49   : > { %p1778_p5 = scmp.eq.s32.totalorder (!%p1777_p0), %s1514_s13, 0 }
  0x4a   : > { %147 = sbr.rel (%p1777_p0) target bundleno = 976 (0x3d0), region = 28 }
  0x51   : > { %1444 = dma.done.wait (%p1778_p5), [#allocation3], 2048   ;;  %p1779_p2 = pmov %p1778_p5 }
  0x52   : > { %s1634_s19 = sand.u32 1, %s1461_s10   ;;  %p1780_p10 = scmp.ne.s32.totalorder %s1770_s15, 0 }
  0x53   : > { %1446 = vsyncadd (%p1779_p2), [#allocation3], 4294965248  ;;  %s948_s23 = sshll.u32 %s1634_s19, 8  ;;  %s154_s29 = scalar_lea.sflag [#allocation6], %s1634_s19 }
  0x54   : > { %s1640_s4 = scalar_lea.vmem [#allocation5], %s948_s23 }
  0x55   : > { %1448 = dma.done.wait (%p1780_p10), %s154_s29, 4096  }
  0x56   : > { %1450 = vsyncadd (%p1780_p10), %s154_s29, 4294963200  ;;  %v180_v0 = vld [vmem:[#allocation2] sm:$0xff]  ;;  %v181_v1 = vld [vmem:[#allocation2 + $0x8] sm:$0xff]  ;;  %s1680_s15 = scalar_lea.vmem [#allocation7], %s948_s23  ;;  %s959_s17 = sshll.u32 %s1514_s13, 12 }
  0x57   : > { %v182_v2 = vld [vmem:[#allocation2 + $0x10] sm:$0xff]  ;;  %v1216_v3 = vpack.c.bf16 %v181_v1, %v180_v0  ;;  %v183_v4 = vld [vmem:[#allocation2 + $0x18] sm:$0xff]  ;;  %v196_v6 = vld [vmem:[%s1640_s4] sm:$0xff]  ;;  %s853_s5 = sshll.u32 %s1680_s15, 4  ;;  %s1718_s28 = scalar_lea.hbm %s1766_s2, %s959_s17  ;;  %s1720_s5 = int_to_ptr.vmem [resolvable:$true] %s853_s5 }
  0x58   : > { %v1220_v5 = vpack.c.bf16 %v183_v4, %v182_v2  ;;  %v184_v7 = vld [vmem:[#allocation2 + $0x20] sm:$0xff]  ;;  %v185_v8 = vld [vmem:[#allocation2 + $0x28] sm:$0xff]  ;;  %1088 = vmatprep.mubr.f32.mxu0 %v196_v6  ;;  %v186_v10 = vld [vmem:[#allocation2 + $0x30] sm:$0xff]  ;;  %s839_s30 = scalar_lea.sflag [#allocation4], %s1634_s19  ;;  %s1399_s3 = scalar_lea.vmem %s1720_s5, 4096 }
  0x59   : > { %1217 = vmatprep.subr.bf16.mxu0 %v1216_v3  ;;  %1249 = vmatprep.subr.bf16.mxu1 %v1216_v3  ;;  %v1224_v9 = vpack.c.bf16 %v185_v8, %v184_v7  ;;  %v187_v11 = vld [vmem:[#allocation2 + $0x38] sm:$0xff]  ;;  %v188_v13 = vld [vmem:[#allocation2 + $0x40] sm:$0xff]  ;;  %v189_v14 = vld [vmem:[#allocation2 + $0x48] sm:$0xff]  ;;  %p1400_p4 = scmp.ne.s32.totalorder %s1720_s5, %s1399_s3  ;;  %s1475_s13 = smov [#allocation7]  }
  0x5a   : > { %1219 = vmatpush3.bf16.xpose.msra.mxu0 %v1216_v3  ;;  %1251 = vmatpush3.bf16.xpose.msra.mxu1 %v1216_v3  ;;  %v1228_v12 = vpack.c.bf16 %v187_v11, %v186_v10  ;;  %v1232_v15 = vpack.c.bf16 %v189_v14, %v188_v13  ;;  %v190_v16 = vld [vmem:[#allocation2 + $0x50] sm:$0xff]  ;;  %v191_v17 = vld [vmem:[#allocation2 + $0x58] sm:$0xff]  ;;  %v192_v19 = vld [vmem:[#allocation2 + $0x60] sm:$0xff]  ;;  %s1403_s6 = sshll.u32 %s1475_s13, 4  ;;  %s1404_s6 = int_to_ptr.vmem [resolvable:$false] %s1403_s6 }
  0x5b   : > { %1221 = vmatprep.subr.bf16.mxu0 %v1220_v5  ;;  %1253 = vmatprep.subr.bf16.mxu1 %v1220_v5  ;;  %v1236_v18 = vpack.c.bf16 %v191_v17, %v190_v16  ;;  %v193_v20 = vld [vmem:[#allocation2 + $0x68] sm:$0xff]  ;;  %v194_v22 = vld [vmem:[#allocation2 + $0x70] sm:$0xff]  ;;  %v195_v23 = vld [vmem:[#allocation2 + $0x78] sm:$0xff]  ;;  %p1401_p6 = pnand %p1400_p4, %p1579_p12  ;;  %s1405_s7 = scalar_lea.vmem %s1404_s6, 8192 }
  0x5c   : > { %v1240_v21 = vpack.c.bf16 %v193_v20, %v192_v19  ;;  %v1244_v24 = vpack.c.bf16 %v195_v23, %v194_v22  ;;  %v197_v25 = vld [vmem:[%s1640_s4 + $0x8] sm:$0xff]  ;;  %v198_v26 = vld [vmem:[%s1640_s4 + $0x10] sm:$0xff]  ;;  %v199_v27 = vld [vmem:[%s1640_s4 + $0x18] sm:$0xff]  ;;  %p1406_p11 = scmp.lt.s32.totalorder %s1720_s5, %s1404_s6  ;;  %p1407_p13 = scmp.lt.s32.totalorder %s1405_s7, %s1399_s3 }
  0x5d   : > { %v200_v28 = vld [vmem:[%s1640_s4 + $0x20] sm:$0xff]  ;;  %v201_v29 = vld [vmem:[%s1640_s4 + $0x28] sm:$0xff]  ;;  %v202_v30 = vld [vmem:[%s1640_s4 + $0x30] sm:$0xff]  ;;  %p1402_p8 = pneg %p1401_p6 }
  0x5e   : > { %v203_v31 = vld [vmem:[%s1640_s4 + $0x38] sm:$0xff]  ;;  %v204_v32 = vld [vmem:[%s1640_s4 + $0x40] sm:$0xff]  ;;  %v205_v33 = vld [vmem:[%s1640_s4 + $0x48] sm:$0xff]  ;;  %p1408_p3 = por %p1407_p13, %p1406_p11 }
  0x5f   : > { %v206_v34 = vld [vmem:[%s1640_s4 + $0x50] sm:$0xff]  ;;  %v207_v35 = vld [vmem:[%s1640_s4 + $0x58] sm:$0xff]  ;;  %v208_v36 = vld [vmem:[%s1640_s4 + $0x60] sm:$0xff] }
  0x60   : > { %v209_v37 = vld [vmem:[%s1640_s4 + $0x68] sm:$0xff]  ;;  %v210_v38 = vld [vmem:[%s1640_s4 + $0x70] sm:$0xff]  ;;  %v211_v39 = vld [vmem:[%s1640_s4 + $0x78] sm:$0xff]  ;;  %p1409_p7 = pnand %p1408_p3, %p1402_p8 }
  0x61   : > { %v212_v40 = vld [vmem:[%s1640_s4 + $0x80] sm:$0xff]  ;;  %v213_v41 = vld [vmem:[%s1640_s4 + $0x88] sm:$0xff]  ;;  %v214_v42 = vld [vmem:[%s1640_s4 + $0x90] sm:$0xff] }
  0x62   : > { %1223 = vmatpush3.bf16.xpose.msra.mxu0 %v1220_v5  ;;  %1255 = vmatpush3.bf16.xpose.msra.mxu1 %v1220_v5  ;;  %v215_v43 = vld [vmem:[%s1640_s4 + $0x98] sm:$0xff]  ;;  %v216_v44 = vld [vmem:[%s1640_s4 + $0xa0] sm:$0xff]  ;;  %v217_v45 = vld [vmem:[%s1640_s4 + $0xa8] sm:$0xff] }
  0x63   : > { %1225 = vmatprep.subr.bf16.mxu0 %v1224_v9  ;;  %1257 = vmatprep.subr.bf16.mxu1 %v1224_v9  ;;  %v218_v46 = vld [vmem:[%s1640_s4 + $0xb0] sm:$0xff]  ;;  %v219_v47 = vld [vmem:[%s1640_s4 + $0xb8] sm:$0xff]  ;;  %v220_v48 = vld [vmem:[%s1640_s4 + $0xc0] sm:$0xff] }
  0x64   : > { %v221_v49 = vld [vmem:[%s1640_s4 + $0xc8] sm:$0xff]  ;;  %v222_v50 = vld [vmem:[%s1640_s4 + $0xd0] sm:$0xff]  ;;  %v223_v51 = vld [vmem:[%s1640_s4 + $0xd8] sm:$0xff] }
  0x65   : > { %v224_v52 = vld [vmem:[%s1640_s4 + $0xe0] sm:$0xff]  ;;  %v225_v53 = vld [vmem:[%s1640_s4 + $0xe8] sm:$0xff]  ;;  %v226_v54 = vld [vmem:[%s1640_s4 + $0xf0] sm:$0xff] }
  0x66   : > { %v227_v55 = vld [vmem:[%s1640_s4 + $0xf8] sm:$0xff] }
  0x6a   : > { %1227 = vmatpush3.bf16.xpose.msra.mxu0 %v1224_v9  ;;  %1259 = vmatpush3.bf16.xpose.msra.mxu1 %v1224_v9 }
  0x6b   : > { %1229 = vmatprep.subr.bf16.mxu0 %v1228_v12  ;;  %1261 = vmatprep.subr.bf16.mxu1 %v1228_v12 }
  0x72   : > { %1231 = vmatpush3.bf16.xpose.msra.mxu0 %v1228_v12  ;;  %1263 = vmatpush3.bf16.xpose.msra.mxu1 %v1228_v12 }
  0x73   : > { %1233 = vmatprep.subr.bf16.mxu0 %v1232_v15  ;;  %1265 = vmatprep.subr.bf16.mxu1 %v1232_v15 }
  0x7a   : > { %1235 = vmatpush3.bf16.xpose.msra.mxu0 %v1232_v15  ;;  %1267 = vmatpush3.bf16.xpose.msra.mxu1 %v1232_v15 }
  0x7b   : > { %1237 = vmatprep.subr.bf16.mxu0 %v1236_v18  ;;  %1269 = vmatprep.subr.bf16.mxu1 %v1236_v18 }
  0x82   : > { %1239 = vmatpush3.bf16.xpose.msra.mxu0 %v1236_v18  ;;  %1271 = vmatpush3.bf16.xpose.msra.mxu1 %v1236_v18 }
  0x83   : > { %1241 = vmatprep.subr.bf16.mxu0 %v1240_v21  ;;  %1273 = vmatprep.subr.bf16.mxu1 %v1240_v21 }
  0x8a   : > { %1243 = vmatpush3.bf16.xpose.msra.mxu0 %v1240_v21  ;;  %1275 = vmatpush3.bf16.xpose.msra.mxu1 %v1240_v21 }
  0x8b   : > { %1245 = vmatprep.subr.bf16.mxu0 %v1244_v24  ;;  %1277 = vmatprep.subr.bf16.mxu1 %v1244_v24 }
  0x92   : > { %1247 = vmatpush3.bf16.xpose.msra.mxu0 %v1244_v24  ;;  %1279 = vmatpush3.bf16.xpose.msra.mxu1 %v1244_v24 }
  0x99   : > { %1089 = vmatmul.mubr.f32.vlgmr.msra.gmra.mrb[0].mxu0 %v197_v25 }
  0x9a   : > { %1091 = vmatprep.mubr.f32.mxu0 %v198_v26 }
  0x9d   : > { %1092 = vmatmul.mubr.f32.gmra.mrb[2].mxu0 %v199_v27 }
  0x9e   : > { %1094 = vmatprep.mubr.f32.mxu0 %v200_v28 }
  0xa1   : > { %1095 = vmatmul.mubr.f32.gmra.mrb[4].mxu0 %v201_v29 }
  0xa2   : > { %1097 = vmatprep.mubr.f32.mxu0 %v202_v30 }
  0xa5   : > { %1098 = vmatmul.mubr.f32.gmra.mrb[6].mxu0 %v203_v31 }
  0xa6   : > { %1100 = vmatprep.mubr.f32.mxu0 %v204_v32 }
  0xa9   : > { %1101 = vmatmul.mubr.f32.gmra.mrb[8].mxu0 %v205_v33 }
  0xaa   : > { %1103 = vmatprep.mubr.f32.mxu0 %v206_v34 }
  0xad   : > { %1104 = vmatmul.mubr.f32.gmra.mrb[10].mxu0 %v207_v35 }
  0xae   : > { %1106 = vmatprep.mubr.f32.mxu0 %v208_v36 }
  0xb1   : > { %1107 = vmatmul.mubr.f32.gmra.mrb[12].mxu0 %v209_v37 }
  0xb2   : > { %1109 = vmatprep.mubr.f32.mxu0 %v210_v38 }
  0xb5   : > { %1110 = vmatmul.mubr.f32.gmra.mrb[14].mxu0 %v211_v39 }
  0xb6   : > { %1112 = vmatprep.mubr.f32.mxu0 %v212_v40 }
  0xb9   : > { %1113 = vmatmul.mubr.f32.gmra.mrb[16].mxu0 %v213_v41 }
  0xba   : > { %1115 = vmatprep.mubr.f32.mxu0 %v214_v42 }
  0xbd   : > { %1116 = vmatmul.mubr.f32.gmra.mrb[18].mxu0 %v215_v43 }
  0xbe   : > { %1118 = vmatprep.mubr.f32.mxu0 %v216_v44 }
  0xc1   : > { %1119 = vmatmul.mubr.f32.gmra.mrb[20].mxu0 %v217_v45 }
  0xc2   : > { %1121 = vmatprep.mubr.f32.mxu0 %v218_v46 }
  0xc5   : > { %1122 = vmatmul.mubr.f32.gmra.mrb[22].mxu0 %v219_v47 }
  0xc6   : > { %1124 = vmatprep.mubr.f32.mxu0 %v220_v48 }
  0xc9   : > { %1125 = vmatmul.mubr.f32.gmra.mrb[24].mxu0 %v221_v49 }
  0xca   : > { %1127 = vmatprep.mubr.f32.mxu0 %v222_v50 }
  0xcd   : > { %1128 = vmatmul.mubr.f32.gmra.mrb[26].mxu0 %v223_v51 }
  0xce   : > { %1130 = vmatprep.mubr.f32.mxu0 %v224_v52 }
  0xd1   : > { %1131 = vmatmul.mubr.f32.gmra.mrb[28].mxu0 %v225_v53 }
  0xd2   : > { %1133 = vmatprep.mubr.f32.mxu0 %v226_v54 }
  0xd5   : > { %1134 = vmatmul.mubr.f32.gmra.mrb[30].mxu0 %v227_v55 }
 0x16c   : > { %v1090_v56 = vpop.f32.mrb[0].mxu0 }
 0x16d   : > { %v294_v57 = vpop.f32.mrb[1].mxu0 }
 0x16e   : > { %453 = vxpose.xlu0.b32.start [1/16] %v294_v57, 128 }
 0x170   : > { %v1093_v58 = vpop.f32.mrb[2].mxu0 }
 0x171   : > { %v304_v59 = vpop.f32.mrb[3].mxu0 }
 0x172   : > { %454 = vxpose.xlu0.b32.cont [2/16] %v1090_v56, 128 }
 0x174   : > { %v1096_v60 = vpop.f32.mrb[4].mxu0 }
 0x175   : > { %v314_v61 = vpop.f32.mrb[5].mxu0 }
 0x176   : > { %455 = vxpose.xlu0.b32.cont [3/16] %v304_v59, 128 }
 0x178   : > { %v1099_v62 = vpop.f32.mrb[6].mxu0 }
 0x179   : > { %v324_v63 = vpop.f32.mrb[7].mxu0 }
 0x17a   : > { %456 = vxpose.xlu0.b32.cont [4/16] %v1093_v58, 128 }
 0x17c   : > { %v1102_v0 = vpop.f32.mrb[8].mxu0 }
 0x17d   : > { %v334_v1 = vpop.f32.mrb[9].mxu0 }
 0x17e   : > { %457 = vxpose.xlu0.b32.cont [5/16] %v314_v61, 128 }
 0x180   : > { %v1105_v2 = vpop.f32.mrb[10].mxu0 }
 0x181   : > { %v344_v3 = vpop.f32.mrb[11].mxu0 }
 0x182   : > { %458 = vxpose.xlu0.b32.cont [6/16] %v1096_v60, 128 }
 0x184   : > { %v1108_v4 = vpop.f32.mrb[12].mxu0 }
 0x185   : > { %v354_v5 = vpop.f32.mrb[13].mxu0 }
 0x186   : > { %459 = vxpose.xlu0.b32.cont [7/16] %v324_v63, 128 }
 0x188   : > { %v1111_v6 = vpop.f32.mrb[14].mxu0 }
 0x189   : > { %v364_v7 = vpop.f32.mrb[15].mxu0 }
 0x18a   : > { %460 = vxpose.xlu0.b32.cont [8/16] %v1099_v62, 128 }
 0x18c   : > { %v1114_v8 = vpop.f32.mrb[16].mxu0 }
 0x18d   : > { %v374_v9 = vpop.f32.mrb[17].mxu0 }
 0x18e   : > { %461 = vxpose.xlu0.b32.cont [9/16] %v334_v1, 128  ;;  %485 = vxpose.xlu1.b32.start [1/16] %v374_v9, 128 }
 0x190   : > { %v1117_v10 = vpop.f32.mrb[18].mxu0 }
 0x191   : > { %v384_v11 = vpop.f32.mrb[19].mxu0 }
 0x192   : > { %462 = vxpose.xlu0.b32.cont [10/16] %v1102_v0, 128  ;;  %486 = vxpose.xlu1.b32.cont [2/16] %v1114_v8, 128 }
 0x194   : > { %v1120_v12 = vpop.f32.mrb[20].mxu0 }
 0x195   : > { %v394_v13 = vpop.f32.mrb[21].mxu0 }
 0x196   : > { %463 = vxpose.xlu0.b32.cont [11/16] %v344_v3, 128  ;;  %487 = vxpose.xlu1.b32.cont [3/16] %v384_v11, 128 }
 0x198   : > { %v1123_v14 = vpop.f32.mrb[22].mxu0 }
 0x199   : > { %v404_v15 = vpop.f32.mrb[23].mxu0 }
 0x19a   : > { %464 = vxpose.xlu0.b32.cont [12/16] %v1105_v2, 128  ;;  %488 = vxpose.xlu1.b32.cont [4/16] %v1117_v10, 128 }
 0x19c   : > { %v1126_v16 = vpop.f32.mrb[24].mxu0 }
 0x19d   : > { %v414_v17 = vpop.f32.mrb[25].mxu0 }
 0x19e   : > { %465 = vxpose.xlu0.b32.cont [13/16] %v354_v5, 128  ;;  %489 = vxpose.xlu1.b32.cont [5/16] %v394_v13, 128 }
 0x1a0   : > { %v1129_v18 = vpop.f32.mrb[26].mxu0 }
 0x1a1   : > { %v424_v19 = vpop.f32.mrb[27].mxu0 }
 0x1a2   : > { %466 = vxpose.xlu0.b32.cont [14/16] %v1108_v4, 128  ;;  %490 = vxpose.xlu1.b32.cont [6/16] %v1120_v12, 128 }
 0x1a4   : > { %v1132_v20 = vpop.f32.mrb[28].mxu0 }
 0x1a5   : > { %v434_v21 = vpop.f32.mrb[29].mxu0 }
 0x1a6   : > { %467 = vxpose.xlu0.b32.cont [15/16] %v364_v7, 128  ;;  %491 = vxpose.xlu1.b32.cont [7/16] %v404_v15, 128 }
 0x1a8   : > { %v1135_v22 = vpop.f32.mrb[30].mxu0 }
 0x1a9   : > { %v444_v23 = vpop.f32.mrb[31].mxu0 }
 0x1aa   : > { %468 = vxpose.xlu0.b32.end [16/16] %v1111_v6, 128  ;;  %492 = vxpose.xlu1.b32.cont [8/16] %v1123_v14, 128 }
 0x1ae   : > { %493 = vxpose.xlu1.b32.cont [9/16] %v414_v17, 128 }
 0x1b2   : > { %494 = vxpose.xlu1.b32.cont [10/16] %v1126_v16, 128 }
 0x1b6   : > { %495 = vxpose.xlu1.b32.cont [11/16] %v424_v19, 128 }
 0x1ba   : > { %496 = vxpose.xlu1.b32.cont [12/16] %v1129_v18, 128 }
 0x1be   : > { %497 = vxpose.xlu1.b32.cont [13/16] %v434_v21, 128 }
 0x1c2   : > { %498 = vxpose.xlu1.b32.cont [14/16] %v1132_v20, 128 }
 0x1c6   : > { %499 = vxpose.xlu1.b32.cont [15/16] %v444_v23, 128 }
 0x1ca   : > { %500 = vxpose.xlu1.b32.end [16/16] %v1135_v22, 128 }
 0x1ee   : > { %v469_v24 = vpop.trf.xlu0 }
 0x1ef   : > { %1168 = vmatprep.mubr.f32.mxu1 %v469_v24 }
 0x1f2   : > { %v470_v25 = vpop.trf.xlu0 }
 0x1f3   : > { %1169 = vmatmul.mubr.f32.vlgmr.msra.gmra.mrb[0].mxu1 %v470_v25 }
 0x1f6   : > { %v471_v26 = vpop.trf.xlu0 }
 0x1f7   : > { %1171 = vmatprep.mubr.f32.mxu1 %v471_v26 }
 0x1fa   : > { %v472_v27 = vpop.trf.xlu0 }
 0x1fb   : > { %1172 = vmatmul.mubr.f32.gmra.mrb[2].mxu1 %v472_v27 }
 0x1fe   : > { %v473_v28 = vpop.trf.xlu0 }
 0x1ff   : > { %1174 = vmatprep.mubr.f32.mxu1 %v473_v28 }
 0x202   : > { %v474_v29 = vpop.trf.xlu0 }
 0x203   : > { %1175 = vmatmul.mubr.f32.gmra.mrb[4].mxu1 %v474_v29 }
 0x206   : > { %v475_v30 = vpop.trf.xlu0 }
 0x207   : > { %1177 = vmatprep.mubr.f32.mxu1 %v475_v30 }
 0x20a   : > { %v476_v31 = vpop.trf.xlu0 }
 0x20b   : > { %1178 = vmatmul.mubr.f32.gmra.mrb[6].mxu1 %v476_v31 }
 0x20e   : > { %v477_v32 = vpop.trf.xlu0  ;;  %v501_v33 = vpop.trf.xlu1 }
 0x20f   : > { %1180 = vmatprep.mubr.f32.mxu1 %v477_v32 }
 0x212   : > { %v478_v34 = vpop.trf.xlu0  ;;  %v502_v35 = vpop.trf.xlu1 }
 0x213   : > { %1181 = vmatmul.mubr.f32.gmra.mrb[8].mxu1 %v478_v34 }
 0x216   : > { %v479_v36 = vpop.trf.xlu0  ;;  %v503_v37 = vpop.trf.xlu1 }
 0x217   : > { %1183 = vmatprep.mubr.f32.mxu1 %v479_v36 }
 0x21a   : > { %v480_v38 = vpop.trf.xlu0  ;;  %v504_v39 = vpop.trf.xlu1 }
 0x21b   : > { %1184 = vmatmul.mubr.f32.gmra.mrb[10].mxu1 %v480_v38 }
 0x21e   : > { %v481_v40 = vpop.trf.xlu0  ;;  %v505_v41 = vpop.trf.xlu1 }
 0x21f   : > { %1186 = vmatprep.mubr.f32.mxu1 %v481_v40 }
 0x222   : > { %v482_v42 = vpop.trf.xlu0  ;;  %v506_v43 = vpop.trf.xlu1 }
 0x223   : > { %1187 = vmatmul.mubr.f32.gmra.mrb[12].mxu1 %v482_v42 }
 0x226   : > { %v483_v44 = vpop.trf.xlu0  ;;  %v507_v45 = vpop.trf.xlu1 }
 0x227   : > { %1189 = vmatprep.mubr.f32.mxu1 %v483_v44 }
 0x22a   : > { %v484_v46 = vpop.trf.xlu0  ;;  %v508_v47 = vpop.trf.xlu1 }
 0x22b   : > { %1190 = vmatmul.mubr.f32.gmra.mrb[14].mxu1 %v484_v46 }
 0x22c   : > { %1192 = vmatprep.mubr.f32.mxu1 %v501_v33 }
 0x22e   : > { %v509_v48 = vpop.trf.xlu1 }
 0x22f   : > { %1193 = vmatmul.mubr.f32.gmra.mrb[16].mxu1 %v502_v35 }
 0x230   : > { %1195 = vmatprep.mubr.f32.mxu1 %v503_v37 }
 0x232   : > { %v510_v49 = vpop.trf.xlu1 }
 0x233   : > { %1196 = vmatmul.mubr.f32.gmra.mrb[18].mxu1 %v504_v39 }
 0x234   : > { %1198 = vmatprep.mubr.f32.mxu1 %v505_v41 }
 0x236   : > { %v511_v50 = vpop.trf.xlu1 }
 0x237   : > { %1199 = vmatmul.mubr.f32.gmra.mrb[20].mxu1 %v506_v43 }
 0x238   : > { %1201 = vmatprep.mubr.f32.mxu1 %v507_v45 }
 0x23a   : > { %v512_v51 = vpop.trf.xlu1 }
 0x23b   : > { %1202 = vmatmul.mubr.f32.gmra.mrb[22].mxu1 %v508_v47 }
 0x23c   : > { %1204 = vmatprep.mubr.f32.mxu1 %v509_v48 }
 0x23e   : > { %v513_v52 = vpop.trf.xlu1 }
 0x23f   : > { %1205 = vmatmul.mubr.f32.gmra.mrb[24].mxu1 %v510_v49 }
 0x240   : > { %1207 = vmatprep.mubr.f32.mxu1 %v511_v50 }
 0x242   : > { %v514_v53 = vpop.trf.xlu1 }
 0x243   : > { %1208 = vmatmul.mubr.f32.gmra.mrb[26].mxu1 %v512_v51 }
 0x244   : > { %1210 = vmatprep.mubr.f32.mxu1 %v513_v52 }
 0x246   : > { %v515_v54 = vpop.trf.xlu1 }
 0x247   : > { %1211 = vmatmul.mubr.f32.gmra.mrb[28].mxu1 %v514_v53 }
 0x248   : > { %1213 = vmatprep.mubr.f32.mxu1 %v515_v54 }
 0x24a   : > { %v516_v55 = vpop.trf.xlu1 }
 0x24b   : > { %1214 = vmatmul.mubr.f32.gmra.mrb[30].mxu1 %v516_v55 }
 0x2c6   : > { %v1170_v56 = vpop.f32.mrb[0].mxu1 }
 0x2c7   : > { %v583_v57 = vpop.f32.mrb[1].mxu1 }
 0x2c8   : > { %742 = vxpose.xlu0.b32.start [1/16] %v583_v57, 128 }
 0x2cc   : > { %743 = vxpose.xlu0.b32.cont [2/16] %v1170_v56, 128 }
 0x2ce   : > { %v1173_v58 = vpop.f32.mrb[2].mxu1 }
 0x2cf   : > { %v593_v59 = vpop.f32.mrb[3].mxu1 }
 0x2d0   : > { %744 = vxpose.xlu0.b32.cont [3/16] %v593_v59, 128 }
 0x2d4   : > { %745 = vxpose.xlu0.b32.cont [4/16] %v1173_v58, 128 }
 0x2d6   : > { %v1176_v60 = vpop.f32.mrb[4].mxu1 }
 0x2d7   : > { %v603_v61 = vpop.f32.mrb[5].mxu1 }
 0x2d8   : > { %746 = vxpose.xlu0.b32.cont [5/16] %v603_v61, 128 }
 0x2dc   : > { %747 = vxpose.xlu0.b32.cont [6/16] %v1176_v60, 128 }
 0x2de   : > { %v1179_v62 = vpop.f32.mrb[6].mxu1 }
 0x2df   : > { %v613_v63 = vpop.f32.mrb[7].mxu1 }
 0x2e0   : > { %748 = vxpose.xlu0.b32.cont [7/16] %v613_v63, 128 }
 0x2e4   : > { %749 = vxpose.xlu0.b32.cont [8/16] %v1179_v62, 128 }
 0x2e6   : > { %v1182_v0 = vpop.f32.mrb[8].mxu1 }
 0x2e7   : > { %v623_v1 = vpop.f32.mrb[9].mxu1 }
 0x2e8   : > { %750 = vxpose.xlu0.b32.cont [9/16] %v623_v1, 128 }
 0x2ec   : > { %751 = vxpose.xlu0.b32.cont [10/16] %v1182_v0, 128 }
 0x2ee   : > { %v1185_v2 = vpop.f32.mrb[10].mxu1 }
 0x2ef   : > { %v633_v3 = vpop.f32.mrb[11].mxu1 }
 0x2f0   : > { %752 = vxpose.xlu0.b32.cont [11/16] %v633_v3, 128 }
 0x2f4   : > { %753 = vxpose.xlu0.b32.cont [12/16] %v1185_v2, 128 }
 0x2f6   : > { %v1188_v4 = vpop.f32.mrb[12].mxu1 }
 0x2f7   : > { %v643_v5 = vpop.f32.mrb[13].mxu1 }
 0x2f8   : > { %754 = vxpose.xlu0.b32.cont [13/16] %v643_v5, 128 }
 0x2fc   : > { %755 = vxpose.xlu0.b32.cont [14/16] %v1188_v4, 128 }
 0x2fe   : > { %v1191_v6 = vpop.f32.mrb[14].mxu1 }
 0x2ff   : > { %v653_v7 = vpop.f32.mrb[15].mxu1 }
 0x300   : > { %756 = vxpose.xlu0.b32.cont [15/16] %v653_v7, 128 }
 0x302   : > { %v1194_v8 = vpop.f32.mrb[16].mxu1 }
 0x303   : > { %v663_v9 = vpop.f32.mrb[17].mxu1 }
 0x304   : > { %757 = vxpose.xlu0.b32.end [16/16] %v1191_v6, 128  ;;  %774 = vxpose.xlu1.b32.start [1/16] %v663_v9, 128 }
 0x306   : > { %v1197_v10 = vpop.f32.mrb[18].mxu1 }
 0x307   : > { %v673_v11 = vpop.f32.mrb[19].mxu1 }
 0x308   : > { %775 = vxpose.xlu1.b32.cont [2/16] %v1194_v8, 128 }
 0x30a   : > { %v1200_v12 = vpop.f32.mrb[20].mxu1 }
 0x30b   : > { %v683_v13 = vpop.f32.mrb[21].mxu1 }
 0x30c   : > { %776 = vxpose.xlu1.b32.cont [3/16] %v673_v11, 128 }
 0x30e   : > { %v1203_v14 = vpop.f32.mrb[22].mxu1 }
 0x30f   : > { %v693_v15 = vpop.f32.mrb[23].mxu1 }
 0x310   : > { %777 = vxpose.xlu1.b32.cont [4/16] %v1197_v10, 128 }
 0x312   : > { %v1206_v16 = vpop.f32.mrb[24].mxu1 }
 0x313   : > { %v703_v17 = vpop.f32.mrb[25].mxu1 }
 0x314   : > { %778 = vxpose.xlu1.b32.cont [5/16] %v683_v13, 128 }
 0x316   : > { %v1209_v18 = vpop.f32.mrb[26].mxu1 }
 0x317   : > { %v713_v19 = vpop.f32.mrb[27].mxu1 }
 0x318   : > { %779 = vxpose.xlu1.b32.cont [6/16] %v1200_v12, 128 }
 0x31a   : > { %v1212_v20 = vpop.f32.mrb[28].mxu1 }
 0x31b   : > { %v723_v21 = vpop.f32.mrb[29].mxu1 }
 0x31c   : > { %780 = vxpose.xlu1.b32.cont [7/16] %v693_v15, 128 }
 0x31e   : > { %v1215_v22 = vpop.f32.mrb[30].mxu1 }
 0x31f   : > { %v733_v23 = vpop.f32.mrb[31].mxu1 }
 0x320   : > { %781 = vxpose.xlu1.b32.cont [8/16] %v1203_v14, 128 }
 0x324   : > { %782 = vxpose.xlu1.b32.cont [9/16] %v703_v17, 128 }
 0x328   : > { %783 = vxpose.xlu1.b32.cont [10/16] %v1206_v16, 128 }
 0x32c   : > { %784 = vxpose.xlu1.b32.cont [11/16] %v713_v19, 128 }
 0x330   : > { %785 = vxpose.xlu1.b32.cont [12/16] %v1209_v18, 128 }
 0x334   : > { %786 = vxpose.xlu1.b32.cont [13/16] %v723_v21, 128 }
 0x338   : > { %787 = vxpose.xlu1.b32.cont [14/16] %v1212_v20, 128 }
 0x33c   : > { %788 = vxpose.xlu1.b32.cont [15/16] %v733_v23, 128 }
 0x340   : > { %789 = vxpose.xlu1.b32.end [16/16] %v1215_v22, 128 }
 0x348   : > { %v758_v24 = vpop.trf.xlu0 }
 0x349   : > { %806 = vst [vmem:[%s1680_s15] sm:$0xff] %v758_v24 }
 0x34c   : > { %v759_v25 = vpop.trf.xlu0 }
 0x34d   : > { %807 = vst [vmem:[%s1680_s15 + $0x8] sm:$0xff] %v759_v25 }
 0x350   : > { %v760_v26 = vpop.trf.xlu0 }
 0x351   : > { %808 = vst [vmem:[%s1680_s15 + $0x10] sm:$0xff] %v760_v26 }
 0x354   : > { %v761_v27 = vpop.trf.xlu0 }
 0x355   : > { %809 = vst [vmem:[%s1680_s15 + $0x18] sm:$0xff] %v761_v27 }
 0x358   : > { %v762_v28 = vpop.trf.xlu0 }
 0x359   : > { %810 = vst [vmem:[%s1680_s15 + $0x20] sm:$0xff] %v762_v28 }
 0x35c   : > { %v763_v29 = vpop.trf.xlu0 }
 0x35d   : > { %811 = vst [vmem:[%s1680_s15 + $0x28] sm:$0xff] %v763_v29 }
 0x360   : > { %v764_v30 = vpop.trf.xlu0 }
 0x361   : > { %812 = vst [vmem:[%s1680_s15 + $0x30] sm:$0xff] %v764_v30 }
 0x364   : > { %v765_v31 = vpop.trf.xlu0 }
 0x365   : > { %813 = vst [vmem:[%s1680_s15 + $0x38] sm:$0xff] %v765_v31 }
 0x368   : > { %v766_v32 = vpop.trf.xlu0 }
 0x369   : > { %814 = vst [vmem:[%s1680_s15 + $0x40] sm:$0xff] %v766_v32 }
 0x36c   : > { %v767_v33 = vpop.trf.xlu0 }
 0x36d   : > { %815 = vst [vmem:[%s1680_s15 + $0x48] sm:$0xff] %v767_v33 }
 0x370   : > { %v768_v34 = vpop.trf.xlu0 }
 0x371   : > { %816 = vst [vmem:[%s1680_s15 + $0x50] sm:$0xff] %v768_v34 }
 0x374   : > { %v769_v35 = vpop.trf.xlu0 }
 0x375   : > { %817 = vst [vmem:[%s1680_s15 + $0x58] sm:$0xff] %v769_v35 }
 0x378   : > { %v770_v36 = vpop.trf.xlu0 }
 0x379   : > { %818 = vst [vmem:[%s1680_s15 + $0x60] sm:$0xff] %v770_v36 }
 0x37c   : > { %v771_v37 = vpop.trf.xlu0 }
 0x37d   : > { %819 = vst [vmem:[%s1680_s15 + $0x68] sm:$0xff] %v771_v37 }
 0x380   : > { %v772_v38 = vpop.trf.xlu0 }
 0x381   : > { %820 = vst [vmem:[%s1680_s15 + $0x70] sm:$0xff] %v772_v38 }
 0x384   : > { %v790_v39 = vpop.trf.xlu1  ;;  %v773_v40 = vpop.trf.xlu0 }
 0x385   : > { %822 = vst [vmem:[%s1680_s15 + $0x80] sm:$0xff] %v790_v39  ;;  %821 = vst [vmem:[%s1680_s15 + $0x78] sm:$0xff] %v773_v40 }
 0x388   : > { %v791_v41 = vpop.trf.xlu1 }
 0x389   : > { %823 = vst [vmem:[%s1680_s15 + $0x88] sm:$0xff] %v791_v41 }
 0x38c   : > { %v792_v42 = vpop.trf.xlu1 }
 0x38d   : > { %824 = vst [vmem:[%s1680_s15 + $0x90] sm:$0xff] %v792_v42 }
 0x390   : > { %v793_v43 = vpop.trf.xlu1 }
 0x391   : > { %825 = vst [vmem:[%s1680_s15 + $0x98] sm:$0xff] %v793_v43 }
 0x394   : > { %v794_v44 = vpop.trf.xlu1 }
 0x395   : > { %826 = vst [vmem:[%s1680_s15 + $0xa0] sm:$0xff] %v794_v44 }
 0x398   : > { %v795_v45 = vpop.trf.xlu1 }
 0x399   : > { %827 = vst [vmem:[%s1680_s15 + $0xa8] sm:$0xff] %v795_v45 }
 0x39c   : > { %v796_v46 = vpop.trf.xlu1 }
 0x39d   : > { %828 = vst [vmem:[%s1680_s15 + $0xb0] sm:$0xff] %v796_v46 }
 0x3a0   : > { %v797_v47 = vpop.trf.xlu1 }
 0x3a1   : > { %829 = vst [vmem:[%s1680_s15 + $0xb8] sm:$0xff] %v797_v47 }
 0x3a4   : > { %v798_v48 = vpop.trf.xlu1 }
 0x3a5   : > { %830 = vst [vmem:[%s1680_s15 + $0xc0] sm:$0xff] %v798_v48 }
 0x3a8   : > { %v799_v49 = vpop.trf.xlu1 }
 0x3a9   : > { %831 = vst [vmem:[%s1680_s15 + $0xc8] sm:$0xff] %v799_v49 }
 0x3ac   : > { %v800_v50 = vpop.trf.xlu1 }
 0x3ad   : > { %832 = vst [vmem:[%s1680_s15 + $0xd0] sm:$0xff] %v800_v50 }
 0x3b0   : > { %v801_v51 = vpop.trf.xlu1 }
 0x3b1   : > { %833 = vst [vmem:[%s1680_s15 + $0xd8] sm:$0xff] %v801_v51 }
 0x3b4   : > { %v802_v52 = vpop.trf.xlu1 }
 0x3b5   : > { %834 = vst [vmem:[%s1680_s15 + $0xe0] sm:$0xff] %v802_v52 }
 0x3b8   : > { %v803_v53 = vpop.trf.xlu1 }
 0x3b9   : > { %835 = vst [vmem:[%s1680_s15 + $0xe8] sm:$0xff] %v803_v53 }
 0x3bc   : > { %v804_v54 = vpop.trf.xlu1 }
 0x3bd   : > { %836 = vst [vmem:[%s1680_s15 + $0xf0] sm:$0xff] %v804_v54 }
 0x3c0   : > { %v805_v55 = vpop.trf.xlu1 }
 0x3c1   : > { %837 = vst [vmem:[%s1680_s15 + $0xf8] sm:$0xff] %v805_v55 }
 0x3c2   : > { %1412 = shalt.err (!%p1409_p7)
}
 0x3c3   : > { %s1413_s20 = scalar_lea.hbm %s1718_s28, 4096  ;;  %s1417_s25 = scalar_lea.hbm %s1766_s2, 16384 }
 0x3c4   : > { %p1414_p9 = scmp.ne.s32.totalorder %s1718_s28, %s1413_s20  ;;  %p1418_p5 = scmp.lt.u32.totalorder %s1718_s28, %s1766_s2 }
 0x3c5   : > { %p1419_p2 = scmp.lt.u32.totalorder %s1417_s25, %s1413_s20  ;;  %p1421_p4 = scmp.lt.u32.totalorder %s1413_s20, %s1718_s28 }
 0x3c6   : > { %p1415_p1 = pnand %p1414_p9, %p1579_p12 }
 0x3c7   : > { %p1420_p10 = por %p1419_p2, %p1418_p5 }
 0x3c8   : > { %p1416_p0 = pneg %p1415_p1 }
 0x3c9   : > { %p1422_p6 = por %p1421_p4, %p1420_p10 }
 0x3cb   : > { %p1423_p8 = pnand %p1422_p6, %p1416_p0 }
 0x3cd   : > { %1426 = shalt.err (!%p1423_p8)
}
 0x3ce   : > { %s1476_s29 = smov 128   ;;  %s1477_s4 = smov 8  }
 0x3cf   : > { %1286 = dma.vmem_to_hbm [thread:$0]  (%p1579_p12), %s1720_s5, 4096, %s1718_s28, %s839_s30, %s1476_s29, %s1476_s29, %s1477_s4  }
 0x3d0 PF: > { %p1303_p11 = scmp.ge.s32.totalorder %s1469_s12, 2  ;;  %s868_s15 = sand.u32 1, %s1457_s9  }
 0x3d1   : > { %p1781_p13 = scmp.ne.s32.totalorder %s1771_s16, 0  ;;  %s869_s17 = scalar_lea.sflag [#allocation4], %s868_s15 }
 0x3d3   : > { %p1297_p3 = pnand %p1303_p11, %p1781_p13 }
 0x3d5   : > { %1452 = dma.done.wait (!%p1297_p3), %s869_s17, 4096  }
 0x3d6   : > { %1454 = vsyncadd (!%p1297_p3), %s869_s17, 4294963200  ;;  %p16_p7 = scmp.ge.s32.totalorder %s1546_s21, 6   ;;  %s1782_s9 = smov %s1461_s10 }
 0x3d7   : > { %s1783_s10 = smov %s1465_s11  ;;  %s1784_s11 = smov %s1575_s8 }
 0x3d8   : > { %s1785_s12 = smov %s1546_s21  ;;  %18 = sbr.rel (!%p16_p7) target bundleno = 6 (0x6), region = 78 }
 0x3df   :  { %874 = vsyncpa [#allocation3], 1 }
 0x3e0   :  { %876 = vsyncpa [#allocation3 + $0x1], 1 }
 0x3e1   :  { %877 = vsyncpa [#allocation6], 1 }
 0x3e2   :  { %879 = vsyncpa [#allocation6 + $0x1], 1 }
 0x3e3   :  { %880 = vsyncpa [#allocation4], 1 }
 0x3e4   :  { %882 = vsyncpa [#allocation4 + $0x1], 1 }

</bundles_post_ra>
